<compile_context>
chip_gen: v6e
topology: v6e:2x2x1
jax: 0.10.0
libtpu: 0.0.40
codegen_flags: <defaults>
</compile_context>

<pallas_src>
import functools

import jax
import jax.numpy as jnp
from jax import lax
from jax.experimental import pallas as pl
from jax.experimental.pallas import tpu as pltpu


def _round_up(x, m):
    return ((x + m - 1) // m) * m


def pg_loss_kernel(pred_ref, target_ref, reward_ref, out_ref):
    j = pl.program_id(1)                     # vocab (reduction) axis
    TB, TV = pred_ref.shape

    # Zero the f32 per-row accumulator (the resident output block) at the
    # first vocab step.
    @pl.when(j == 0)
    def _():
        out_ref[...] = jnp.zeros_like(out_ref)

    pred = pred_ref[...].astype(jnp.float32)      # (TB, TV), f32 accumulation
    tgt = target_ref[...]                         # (TB, 1) int32

    # One-hot mask against ABSOLUTE column ids for this vocab tile (VPU work;
    # the compare/select is hidden under the HBM stream).
    col_ids = j * TV + lax.broadcasted_iota(jnp.int32, (TB, TV), 1)
    one_hot = col_ids == tgt                      # broadcast (TB,1) -> (TB,TV)

    # Reduce the masked tile along the vocab axis (XLU) -> (TB, 1) partial,
    # then accumulate.  Reward multiply is deferred to the final step: B muls
    # instead of B*V.
    picked = jnp.where(one_hot, pred, 0.0)
    out_ref[...] += jnp.sum(picked, axis=1, keepdims=True)

    # Finalize on the last vocab step: multiply by reward and negate.
    @pl.when(j == pl.num_programs(1) - 1)
    def _():
        out_ref[...] = -(out_ref[...] * reward_ref[...].astype(jnp.float32))


@functools.partial(jax.jit, static_argnames=("tb", "tv"))
def pg_loss(pred, target, reward, *, tb=256, tv=1024):
    """pred: (B, V) float, target: (B,) int, reward: (B,) float -> scalar f32."""
    B, V = pred.shape

    # Tile sizes: lane-dense (multiple of 128 on vocab), sublane multiple of 8.
    TB = min(tb, _round_up(B, 8))
    TV = min(tv, _round_up(V, 128))
    B_pad = _round_up(B, TB)
    V_pad = _round_up(V, TV)
    pad_b = B_pad - B
    pad_v = V_pad - V

    # Pad only when needed (aligned shapes take the zero-copy path).  Padded
    # rows get reward = 0 -> contribute 0; padded columns are never selected
    # because target < V.
    if pad_b or pad_v:
        pred_p = jnp.pad(pred, ((0, pad_b), (0, pad_v)))
    else:
        pred_p = pred
    target_p = jnp.pad(target.astype(jnp.int32), (0, pad_b)).reshape(B_pad, 1)
    reward_p = jnp.pad(reward.astype(jnp.float32), (0, pad_b)).reshape(B_pad, 1)

    grid = (B_pad // TB, V_pad // TV)

    itemsize = pred.dtype.itemsize
    cost = pl.CostEstimate(
        flops=2 * B_pad * V_pad,
        transcendentals=0,
        bytes_accessed=B_pad * V_pad * itemsize + B_pad * (4 + 4) + B_pad * 4,
    )

    partials = pl.pallas_call(
        pg_loss_kernel,
        out_shape=jax.ShapeDtypeStruct((B_pad, 1), jnp.float32),
        grid_spec=pltpu.PrefetchScalarGridSpec(
            num_scalar_prefetch=0,
            grid=grid,
            in_specs=[
                pl.BlockSpec((TB, TV), lambda i, j: (i, j)),   # pred tile
                pl.BlockSpec((TB, 1), lambda i, j: (i, 0)),    # target (per row-block)
                pl.BlockSpec((TB, 1), lambda i, j: (i, 0)),    # reward (per row-block)
            ],
            out_specs=pl.BlockSpec((TB, 1), lambda i, j: (i, 0)),  # f32 accumulator
        ),
        compiler_params=pltpu.CompilerParams(
            dimension_semantics=("parallel", "arbitrary"),
        ),
        cost_estimate=cost,
    )(pred_p, target_p, reward_p)

    # Tiny final reduction of per-row partials (padded rows are exactly 0).
    return jnp.sum(partials[:B, 0])


def pg_loss_ref(pred, target, reward):
    """Pure-JAX reference for correctness check."""
    gathered = jnp.take_along_axis(
        pred.astype(jnp.float32), target[:, None].astype(jnp.int32), axis=1
    )[:, 0]
    return -jnp.sum(gathered * reward.astype(jnp.float32))


if __name__ == "__main__":
    key = jax.random.PRNGKey(0)
    k1, k2, k3 = jax.random.split(key, 3)

    batch, num_classes = 4, 16
    pred = jax.random.normal(k1, (batch, num_classes), dtype=jnp.float32)
    target = jax.random.randint(k2, (batch,), 0, num_classes, dtype=jnp.int32)
    reward = jax.random.uniform(k3, (batch,), dtype=jnp.float32)

    loss = pg_loss(pred, target, reward)
    jax.block_until_ready(loss)

    ref = pg_loss_ref(pred, target, reward)
    assert jnp.allclose(loss, ref, rtol=1e-6, atol=1e-6), (loss, ref)

    # Also exercise a shape that actually tiles (multiple row/vocab blocks,
    # non-aligned dims) to validate the grid / accumulator / padding path.
    b2, v2 = 37, 700
    k4, k5, k6 = jax.random.split(k3, 3)
    pred2 = jax.random.normal(k4, (b2, v2), dtype=jnp.float32)
    target2 = jax.random.randint(k5, (b2,), 0, v2, dtype=jnp.int32)
    reward2 = jax.random.uniform(k6, (b2,), dtype=jnp.float32)
    loss2 = pg_loss(pred2, target2, reward2, tb=8, tv=128)
    jax.block_until_ready(loss2)
    ref2 = pg_loss_ref(pred2, target2, reward2)
    assert jnp.allclose(loss2, ref2, rtol=1e-5, atol=1e-5), (loss2, ref2)

    # Aligned larger case exercising the zero-copy (no-pad) path.
    b3, v3 = 256, 2048
    k7, k8, k9 = jax.random.split(k6, 3)
    pred3 = jax.random.normal(k7, (b3, v3), dtype=jnp.float32)
    target3 = jax.random.randint(k8, (b3,), 0, v3, dtype=jnp.int32)
    reward3 = jax.random.uniform(k9, (b3,), dtype=jnp.float32)
    loss3 = pg_loss(pred3, target3, reward3)
    jax.block_until_ready(loss3)
    ref3 = pg_loss_ref(pred3, target3, reward3)
    assert jnp.allclose(loss3, ref3, rtol=1e-5, atol=1e-5), (loss3, ref3)

    print("KERNEL_OK")
</pallas_src>

<mosaic_0001>
module attributes {stable_mosaic.version = 11 : i64} {
  func.func @pg_loss_kernel(%arg0: i32, %arg1: i32, %arg2: memref<8x128xf32, #tpu.memory_space<vmem>>, %arg3: memref<8x1xi32, #tpu.memory_space<vmem>>, %arg4: memref<8x1xf32, #tpu.memory_space<vmem>>, %arg5: memref<8x1xf32, #tpu.memory_space<vmem>>) attributes {dimension_semantics = [#tpu.dimension_semantics<parallel>, #tpu.dimension_semantics<arbitrary>], iteration_bounds = array<i64: 1, 1>, scalar_prefetch = 0 : i64, scratch_operands = 0 : i64, tpu.core_type = #tpu.core_type<tc>, window_params = [{transform_indices = @transform_0, window_bounds = array<i64: 8, 128>}, {transform_indices = @transform_1, window_bounds = array<i64: 8, 1>}, {transform_indices = @transform_2, window_bounds = array<i64: 8, 1>}, {transform_indices = @transform_3, window_bounds = array<i64: 8, 1>}]} {
    %c0_i32 = arith.constant 0 : i32
    %0 = arith.cmpi eq, %arg1, %c0_i32 : i32
    %1 = arith.extui %0 : i1 to i32
    %c0_i32_0 = arith.constant 0 : i32
    %2 = arith.cmpi ne, %1, %c0_i32_0 : i32
    scf.if %2 {
      %cst_11 = arith.constant 0.000000e+00 : f32
      %21 = vector.broadcast %cst_11 : f32 to vector<8x1xf32>
      %c0_12 = arith.constant 0 : index
      %c0_13 = arith.constant 0 : index
      %22 = vector.load %arg5[%c0_12, %c0_13] : memref<8x1xf32, #tpu.memory_space<vmem>>, vector<8x1xf32>
      tpu.vector_store %arg5[%c0_12, %c0_13], %21 {strides = array<i32>} : memref<8x1xf32, #tpu.memory_space<vmem>>, vector<8x1xf32>,
    } else {
    }
    %c0 = arith.constant 0 : index
    %c0_1 = arith.constant 0 : index
    %3 = vector.load %arg2[%c0, %c0_1] : memref<8x128xf32, #tpu.memory_space<vmem>>, vector<8x128xf32>
    %c0_2 = arith.constant 0 : index
    %c0_3 = arith.constant 0 : index
    %4 = vector.load %arg3[%c0_2, %c0_3] : memref<8x1xi32, #tpu.memory_space<vmem>>, vector<8x1xi32>
    %c128_i32 = arith.constant 128 : i32
    %5 = arith.muli %arg1, %c128_i32 : i32
    %6 = tpu.iota {dimensions = array<i32: 1>} : vector<8x128xi32>
    %7 = vector.broadcast %5 : i32 to vector<8x128xi32>
    %8 = arith.addi %7, %6 : vector<8x128xi32>
    %9 = vector.broadcast %4 : vector<8x1xi32> to vector<8x128xi32>
    %10 = arith.cmpi eq, %8, %9 : vector<8x128xi32>
    %cst = arith.constant 0.000000e+00 : f32
    %11 = vector.broadcast %cst : f32 to vector<8x128xf32>
    %12 = arith.select %10, %3, %11 : vector<8x128xi1>, vector<8x128xf32>
    %c0_4 = arith.constant 0 : index
    %c0_5 = arith.constant 0 : index
    %13 = vector.load %arg5[%c0_4, %c0_5] : memref<8x1xf32, #tpu.memory_space<vmem>>, vector<8x1xf32>
    %cst_6 = arith.constant dense<0.000000e+00> : vector<8xf32>
    %14 = vector.multi_reduction <add>, %12, %cst_6 [1] : vector<8x128xf32> to vector<8xf32>
    %15 = vector.shape_cast %14 : vector<8xf32> to vector<8x1xf32>
    %16 = arith.addf %13, %15 : vector<8x1xf32>
    %c0_7 = arith.constant 0 : index
    %c0_8 = arith.constant 0 : index
    %17 = vector.load %arg5[%c0_7, %c0_8] : memref<8x1xf32, #tpu.memory_space<vmem>>, vector<8x1xf32>
    tpu.vector_store %arg5[%c0_7, %c0_8], %16 {strides = array<i32>} : memref<8x1xf32, #tpu.memory_space<vmem>>, vector<8x1xf32>,
    %c0_i32_9 = arith.constant 0 : i32
    %18 = arith.cmpi eq, %arg1, %c0_i32_9 : i32
    %19 = arith.extui %18 : i1 to i32
    %c0_i32_10 = arith.constant 0 : i32
    %20 = arith.cmpi ne, %19, %c0_i32_10 : i32
    scf.if %20 {
      %c0_11 = arith.constant 0 : index
      %c0_12 = arith.constant 0 : index
      %21 = vector.load %arg5[%c0_11, %c0_12] : memref<8x1xf32, #tpu.memory_space<vmem>>, vector<8x1xf32>
      %c0_13 = arith.constant 0 : index
      %c0_14 = arith.constant 0 : index
      %22 = vector.load %arg4[%c0_13, %c0_14] : memref<8x1xf32, #tpu.memory_space<vmem>>, vector<8x1xf32>
      %23 = arith.mulf %21, %22 : vector<8x1xf32>
      %cst_15 = arith.constant 0.000000e+00 : f32
      %24 = vector.broadcast %cst_15 : f32 to vector<8x1xf32>
      %25 = arith.subf %24, %23 : vector<8x1xf32>
      %c0_16 = arith.constant 0 : index
      %c0_17 = arith.constant 0 : index
      %26 = vector.load %arg5[%c0_16, %c0_17] : memref<8x1xf32, #tpu.memory_space<vmem>>, vector<8x1xf32>
      tpu.vector_store %arg5[%c0_16, %c0_17], %25 {strides = array<i32>} : memref<8x1xf32, #tpu.memory_space<vmem>>, vector<8x1xf32>,
    } else {
    }
    return
  }
  func.func @transform_0(%arg0: i32, %arg1: i32) -> (i32, i32) {
    %c0_i32 = arith.constant 0 : i32
    return %arg0, %arg1 : i32, i32
  }
  func.func @transform_1(%arg0: i32, %arg1: i32) -> (i32, i32) {
    %c0_i32 = arith.constant 0 : i32
    %c0_i32_0 = arith.constant 0 : i32
    return %arg0, %c0_i32 : i32, i32
  }
  func.func @transform_2(%arg0: i32, %arg1: i32) -> (i32, i32) {
    %c0_i32 = arith.constant 0 : i32
    %c0_i32_0 = arith.constant 0 : i32
    return %arg0, %c0_i32 : i32, i32
  }
  func.func @transform_3(%arg0: i32, %arg1: i32) -> (i32, i32) {
    %c0_i32 = arith.constant 0 : i32
    %c0_i32_0 = arith.constant 0 : i32
    return %arg0, %c0_i32 : i32, i32
  }
}

</mosaic_0001>

<bundles_post_ra>
// kernel: pg_loss.1
= control target key start
LH: loop header
LB: loop body
LE: loop exit
PB: predicated region body
PF: predicated region fallthrough
CT: control target
= control target key end

     0   :  { %vm18_vm0 = vcmask 7168   ;;  %v53_v0 = vmov 0   ;;  %v54_v2 = vmov 0.0   ;;  %v23_v3 = vlaneseq  ;;  %s102_s1 = inlined_call_operand.vmem [shape: s32[8,1], index: 1, kind: input, shape index: {}]   ;;  %s103_s3 = inlined_call_operand.vmem [shape: f32[8,1], index: 3, kind: output, shape index: {}]   ;;  %s104_s0 = inlined_call_operand.vmem [shape: f32[8,128], index: 0, kind: input, shape index: {}]   ;;  %s105_s2 = inlined_call_operand.vmem [shape: f32[8,1], index: 2, kind: input, shape index: {}]  }
   0x1   :  { %52 = vset.pattern.permute.xlu0 %v53_v0  ;;  %v21_v1 = vld [vmem:[%s102_s1] sm:$0xff]  ;;  %19 = vst.msk [vmem:[%s103_s3] sm:$0xff] %vm18_vm0, %v54_v2 }
   0x2   :  { %28 = vperm.xlu0 %52, %v21_v1   ;;  %v24_v4 = vand.u32 127, %v23_v3  ;;  %v20_v5 = vld [vmem:[%s104_s0] sm:$0xff] }
   0x3   :  { %v42_v11 = vld [vmem:[%s105_s2] sm:$0xff] }
   0x8   :  { %v32_v8 = vld [vmem:[%s103_s3] sm:$0xff] }
  0x7d   :  { %v29_v6 = vpop.permute.xlu0 %28 }
  0x7e   :  { %vm30_vm1 = vcmp.eq.s32.totalorder %v24_v4, %v29_v6 }
  0x7f   :  { %v31_v7 = vsel %vm30_vm1, %v20_v5, 0.0 }
  0x80   :  { %33 = vadd.xlane.f32.xlu0 %v31_v7 }
 0x109   :  { %v34_v9 = vpop.xlane.xlu0 %33 }
 0x10a   :  { %v35_v10 = vadd.f32 %v34_v9, %v32_v8 }
 0x10c   :  { %37 = vst.msk [vmem:[%s103_s3] sm:$0xff] %vm18_vm0, %v35_v10 }
 0x113   :  { %v41_v12 = vld [vmem:[%s103_s3] sm:$0xff] }
 0x114   :  { %v43_v13 = vmul.f32 %v42_v11, %v41_v12 }
 0x116   :  { %v44_v14 = vsub.f32 0.0, %v43_v13 }
 0x118   :  { %45 = vst.msk [vmem:[%s103_s3] sm:$0xff] %vm18_vm0, %v44_v14 }

</bundles_post_ra>
